<compile_context>
chip_gen: v5e
topology: v5e:2x2
jax: 0.10.0
libtpu: 0.0.40
codegen_flags: <defaults>
</compile_context>

<pallas_src>
import jax
import jax.numpy as jnp
from jax.experimental import pallas as pl
from jax.experimental.pallas import tpu as pltpu


def _round_up(n: int, m: int) -> int:
    return ((n + m - 1) // m) * m


def spg_kernel(x_ref, w1_ref, b1_ref, w2_ref, b2_ref, o_ref):
    # x arrives as f32 (single HBM read); cast to bf16 in-register for the MXU.
    x = x_ref[...].astype(jnp.bfloat16)
    h = jnp.dot(x, w1_ref[...], preferred_element_type=jnp.float32)
    h = jnp.tanh(h + b1_ref[...])                       # f32 bias + tanh (VPU/EUP)
    y = jnp.dot(h.astype(jnp.bfloat16), w2_ref[...],
                preferred_element_type=jnp.float32)      # (tm, act) f32
    o_ref[...] = y + b2_ref[...]                         # small unpadded f32 store


def prepare_params(w1, b1, w2, b2):
    """One-time weight prep (bf16 cast + bias reshape), hoisted off the hot path."""
    return (w1.astype(jnp.bfloat16),
            b1.astype(jnp.float32).reshape(1, -1),
            w2.astype(jnp.bfloat16),
            b2.astype(jnp.float32).reshape(1, -1))


def _pick_tm(B: int) -> int:
    if B > 2048:
        return 1024                          # big mem-bound tiles (~85% HBM roofline)
    if B > 16:
        # Guarantee >= 2 grid tiles so v7x's two TensorCores both get work;
        # 16-aligned keeps the sublane layout clean (multiple of 8).
        return _round_up(pl.cdiv(B, 2), 16)
    return B                                 # tiny batch: one block == full batch dim


def spg_forward(x, params, *, tm=None):
    """Batched SPG forward.

    x      : (obs,) or (B, obs) float32
    params : output of prepare_params(w1, b1, w2, b2)
    Returns (B, act) float32 (B=1 for a 1-D x, matching x.view(1, -1)).
    """
    w1b, b1f, w2b, b2f = params
    if x.ndim == 1:
        x = x.reshape(1, x.shape[0])          # mirrors x.view(1, x.shape[0])
    B, obs = x.shape
    hid = w1b.shape[1]
    act = w2b.shape[1]

    if tm is None:
        tm = _pick_tm(B)
    grid = (pl.cdiv(B, tm),)                  # ragged last tile; OOB rows masked on write

    return pl.pallas_call(
        spg_kernel,
        out_shape=jax.ShapeDtypeStruct((B, act), jnp.float32),
        grid=grid,
        in_specs=[
            pl.BlockSpec((tm, obs), lambda i: (i, 0)),      # x tiles stream (f32)
            pl.BlockSpec((obs, hid), lambda i: (0, 0)),     # w1 resident (bf16)
            pl.BlockSpec((1, hid), lambda i: (0, 0)),       # b1 resident (f32)
            pl.BlockSpec((hid, act), lambda i: (0, 0)),     # w2 resident (bf16)
            pl.BlockSpec((1, act), lambda i: (0, 0)),       # b2 resident (f32)
        ],
        out_specs=pl.BlockSpec((tm, act), lambda i: (i, 0)),
        compiler_params=pltpu.CompilerParams(
            # batch tiles are independent -> shard across v7x's 2 TensorCores
            dimension_semantics=("parallel",),
        ),
    )(x, w1b, b1f, w2b, b2f)


def init_params(key, obs_size, hid, action_size):
    k1, k2, k3, k4 = jax.random.split(key, 4)
    # deterministic synthetic init (uniform, like torch's default Linear scale);
    # weights stored as (in, out) so the kernel computes x @ W + b.
    lim1 = 1.0 / jnp.sqrt(obs_size)
    lim2 = 1.0 / jnp.sqrt(hid)
    w1 = jax.random.uniform(k1, (obs_size, hid), jnp.float32, -lim1, lim1)
    b1 = jax.random.uniform(k2, (hid,), jnp.float32, -lim1, lim1)
    w2 = jax.random.uniform(k3, (hid, action_size), jnp.float32, -lim2, lim2)
    b2 = jax.random.uniform(k4, (action_size,), jnp.float32, -lim2, lim2)
    return w1, b1, w2, b2


if __name__ == "__main__":
    obs_size, hid, action_size = 32, 64, 8      # hid_layers = [64]
    batch = 16                                   # parallel envs / timesteps

    key = jax.random.PRNGKey(0)
    kx, kp = jax.random.split(key)
    x_batch = jax.random.normal(kx, (batch, obs_size), jnp.float32)
    w1, b1, w2, b2 = init_params(kp, obs_size, hid, action_size)
    params = prepare_params(w1, b1, w2, b2)      # one-time weight prep

    # Batched forward (main throughput path).
    out = spg_forward(x_batch, params)
    jax.block_until_ready(out)
    assert out.shape == (batch, action_size)

    # Single-observation path, matching the module's x.view(1, x.shape[0]).
    out1 = spg_forward(x_batch[0], params)
    jax.block_until_ready(out1)
    assert out1.shape == (1, action_size)

    # Ragged multi-tile path: B=100 -> tm=64, grid=(2,), last tile partially OOB.
    x_big = jax.random.normal(kx, (100, obs_size), jnp.float32)
    out_big = spg_forward(x_big, params)
    jax.block_until_ready(out_big)
    assert out_big.shape == (100, action_size)

    # Reference in plain JAX, mirroring the kernel's bf16-input / f32-accum math.
    def ref_fn(xv):
        xr = xv.astype(jnp.bfloat16).astype(jnp.float32)
        w1r = w1.astype(jnp.bfloat16).astype(jnp.float32)
        w2r = w2.astype(jnp.bfloat16).astype(jnp.float32)
        h = jnp.tanh(xr @ w1r + b1)
        return h.astype(jnp.bfloat16).astype(jnp.float32) @ w2r + b2

    ref = ref_fn(x_batch)
    assert jnp.allclose(out, ref, atol=2e-3, rtol=2e-3)
    assert jnp.allclose(out1, ref[:1], atol=2e-3, rtol=2e-3)
    assert jnp.allclose(out_big, ref_fn(x_big), atol=2e-3, rtol=2e-3)

    # Sanity vs. the full-f32 module math (bf16 inputs introduce ~1e-3 error).
    ref_f32 = jnp.tanh(x_batch @ w1 + b1) @ w2 + b2
    assert jnp.allclose(out, ref_f32, atol=5e-2, rtol=5e-2)

    # TODO(synk): the PyTorch forward() calls print(x); omitted as a host-side
    # side effect with no kernel equivalent.
    print("KERNEL_OK")
</pallas_src>

<mosaic_0001>
module attributes {stable_mosaic.version = 11 : i64} {
  func.func @spg_kernel(%arg0: i32, %arg1: memref<16x32xf32, #tpu.memory_space<vmem>>, %arg2: memref<32x64xbf16, #tpu.memory_space<vmem>>, %arg3: memref<1x64xf32, #tpu.memory_space<vmem>>, %arg4: memref<64x8xbf16, #tpu.memory_space<vmem>>, %arg5: memref<1x8xf32, #tpu.memory_space<vmem>>, %arg6: memref<16x8xf32, #tpu.memory_space<vmem>>) attributes {dimension_semantics = [#tpu.dimension_semantics<parallel>], iteration_bounds = array<i64: 1>, scalar_prefetch = 0 : i64, scratch_operands = 0 : i64, tpu.core_type = #tpu.core_type<tc>, window_params = [{transform_indices = @transform_0, window_bounds = array<i64: 16, 32>}, {pipeline_mode = #tpu.pipeline_mode<synchronous>, transform_indices = @transform_1, window_bounds = array<i64: 32, 64>}, {pipeline_mode = #tpu.pipeline_mode<synchronous>, transform_indices = @transform_2, window_bounds = array<i64: 1, 64>}, {pipeline_mode = #tpu.pipeline_mode<synchronous>, transform_indices = @transform_3, window_bounds = array<i64: 64, 8>}, {pipeline_mode = #tpu.pipeline_mode<synchronous>, transform_indices = @transform_4, window_bounds = array<i64: 1, 8>}, {transform_indices = @transform_5, window_bounds = array<i64: 16, 8>}]} {
    %c0 = arith.constant 0 : index
    %c0_0 = arith.constant 0 : index
    %0 = vector.load %arg1[%c0, %c0_0] : memref<16x32xf32, #tpu.memory_space<vmem>>, vector<16x32xf32>
    %1 = arith.truncf %0 : vector<16x32xf32> to vector<16x32xbf16>
    %c0_1 = arith.constant 0 : index
    %c0_2 = arith.constant 0 : index
    %2 = vector.load %arg2[%c0_1, %c0_2] : memref<32x64xbf16, #tpu.memory_space<vmem>>, vector<32x64xbf16>
    %cst = arith.constant dense<0.000000e+00> : vector<16x64xf32>
    %3 = tpu.matmul %1, %2, %cst {dimension_numbers = #tpu.dot_dimension_numbers<[1], [0], [0], [1], [0, 0, 1, 1], [], []>} : vector<16x32xbf16>, vector<32x64xbf16>, vector<16x64xf32> -> vector<16x64xf32>
    %c0_3 = arith.constant 0 : index
    %c0_4 = arith.constant 0 : index
    %4 = vector.load %arg3[%c0_3, %c0_4] : memref<1x64xf32, #tpu.memory_space<vmem>>, vector<1x64xf32>
    %5 = vector.broadcast %4 : vector<1x64xf32> to vector<16x64xf32>
    %6 = arith.addf %3, %5 : vector<16x64xf32>
    %7 = math.tanh %6 : vector<16x64xf32>
    %8 = arith.truncf %7 : vector<16x64xf32> to vector<16x64xbf16>
    %c0_5 = arith.constant 0 : index
    %c0_6 = arith.constant 0 : index
    %9 = vector.load %arg4[%c0_5, %c0_6] : memref<64x8xbf16, #tpu.memory_space<vmem>>, vector<64x8xbf16>
    %cst_7 = arith.constant dense<0.000000e+00> : vector<16x8xf32>
    %10 = tpu.matmul %8, %9, %cst_7 {dimension_numbers = #tpu.dot_dimension_numbers<[1], [0], [0], [1], [0, 0, 1, 1], [], []>} : vector<16x64xbf16>, vector<64x8xbf16>, vector<16x8xf32> -> vector<16x8xf32>
    %c0_8 = arith.constant 0 : index
    %c0_9 = arith.constant 0 : index
    %11 = vector.load %arg5[%c0_8, %c0_9] : memref<1x8xf32, #tpu.memory_space<vmem>>, vector<1x8xf32>
    %12 = vector.broadcast %11 : vector<1x8xf32> to vector<16x8xf32>
    %13 = arith.addf %10, %12 : vector<16x8xf32>
    %c0_10 = arith.constant 0 : index
    %c0_11 = arith.constant 0 : index
    %14 = vector.load %arg6[%c0_10, %c0_11] : memref<16x8xf32, #tpu.memory_space<vmem>>, vector<16x8xf32>
    tpu.vector_store %arg6[%c0_10, %c0_11], %13 {strides = array<i32>} : memref<16x8xf32, #tpu.memory_space<vmem>>, vector<16x8xf32>,
    return
  }
  func.func @transform_0(%arg0: i32) -> (i32, i32) {
    %c0_i32 = arith.constant 0 : i32
    %c0_i32_0 = arith.constant 0 : i32
    return %arg0, %c0_i32 : i32, i32
  }
  func.func @transform_1(%arg0: i32) -> (i32, i32) {
    %c0_i32 = arith.constant 0 : i32
    %c0_i32_0 = arith.constant 0 : i32
    %c0_i32_1 = arith.constant 0 : i32
    return %c0_i32, %c0_i32_0 : i32, i32
  }
  func.func @transform_2(%arg0: i32) -> (i32, i32) {
    %c0_i32 = arith.constant 0 : i32
    %c0_i32_0 = arith.constant 0 : i32
    %c0_i32_1 = arith.constant 0 : i32
    return %c0_i32, %c0_i32_0 : i32, i32
  }
  func.func @transform_3(%arg0: i32) -> (i32, i32) {
    %c0_i32 = arith.constant 0 : i32
    %c0_i32_0 = arith.constant 0 : i32
    %c0_i32_1 = arith.constant 0 : i32
    return %c0_i32, %c0_i32_0 : i32, i32
  }
  func.func @transform_4(%arg0: i32) -> (i32, i32) {
    %c0_i32 = arith.constant 0 : i32
    %c0_i32_0 = arith.constant 0 : i32
    %c0_i32_1 = arith.constant 0 : i32
    return %c0_i32, %c0_i32_0 : i32, i32
  }
  func.func @transform_5(%arg0: i32) -> (i32, i32) {
    %c0_i32 = arith.constant 0 : i32
    %c0_i32_0 = arith.constant 0 : i32
    return %arg0, %c0_i32 : i32, i32
  }
}

</mosaic_0001>

<bundles_post_ra>
// kernel: tpu_custom_call.1
= control target key start
LH: loop header
LB: loop body
LE: loop exit
PB: predicated region body
PF: predicated region fallthrough
CT: control target
= control target key end

     0   :  { %vm44_vm0 = vcmask 261120   ;;  %vm101_vm1 = vcmask 523264   ;;  %vm119_vm2 = vcmask 64512   ;;  %s230_s1 = inlined_call_operand.vmem [shape: bf16[32,64], index: 1, kind: input, shape index: {}]   ;;  %s231_s0 = inlined_call_operand.vmem [shape: f32[16,32], index: 0, kind: input, shape index: {}]   ;;  %s232_s2 = inlined_call_operand.vmem [shape: f32[1,64], index: 2, kind: input, shape index: {}]   ;;  %s233_s4 = inlined_call_operand.vmem [shape: f32[1,8], index: 4, kind: input, shape index: {}]   ;;  %s234_s3 = inlined_call_operand.vmem [shape: bf16[64,8], index: 3, kind: input, shape index: {}]   ;;  %s235_s5 = inlined_call_operand.vmem [shape: f32[16,8], index: 5, kind: output, shape index: {}]  }
   0x1   :  { %v153_v0 = vld [vmem:[%s230_s1 + $0x8] sm:$0xff]  ;;  %v152_v1 = vld [vmem:[%s230_s1] sm:$0xff]  ;;  %v157_v5 = vld [vmem:[%s234_s3 + $0x18] sm:$0xff] }
   0x2   :  { %54 = vmatpush.bf16.msra.mxu0 %v153_v0  ;;  %v21_v2 = vld [vmem:[%s231_s0] sm:$0xff]  ;;  %v22_v3 = vld [vmem:[%s231_s0 + $0x8] sm:$0xff]  ;;  %109 = vmatpush.bf16.msra.mxu1 %v157_v5  ;;  %v156_v6 = vld [vmem:[%s234_s3 + $0x10] sm:$0xff] }
   0x3   :  { %v23_v4 = vpack.c.bf16 %v22_v3, %v21_v2  ;;  %v155_v7 = vld [vmem:[%s234_s3 + $0x8] sm:$0xff]  ;;  %v154_v8 = vld [vmem:[%s234_s3] sm:$0xff] }
   0x4   :  { %v158_v10 = vld [vmem:[%s232_s2] ss:$0 sm:$0xff] }
   0x5   :  { %v159_v17 = vld [vmem:[%s233_s4] ss:$0 sm:$0xff] }
   0x6   :  { %55 = vmatpush.bf16.msra.mxu0 %v152_v1  ;;  %110 = vmatpush.bf16.msra.mxu1 %v156_v6 }
   0x9   :  { %134 = vmatmul.msk.bf16.vlgmr.msra.gmra.mxu0 %vm44_vm0, %v23_v4 }
   0xa   :  { %111 = vmatpush.bf16.msra.mxu1 %v155_v7 }
   0xe   :  { %112 = vmatpush.bf16.msra.mxu1 %v154_v8 }
  0x86   :  { %v57_v9 = vpop.f32.mrf.mxu0 }
  0x87   :  { %v58_v11 = vadd.f32 %v158_v10, %v57_v9 }
  0x89   :  { %160 = vtanh.f32 %v58_v11 }
  0x8e   :  { %v59_v12 = vpop.f32.mrf.mxu0 }
  0x8f   :  { %v60_v13 = vadd.f32 %v158_v10, %v59_v12  ;;  %v161_v14 = vpop.eup %160 }
  0x91   :  { %162 = vtanh.f32 %v60_v13 }
  0x97   :  { %v163_v15 = vpop.eup %162 }
  0x98   :  { %v64_v16 = vpack.c.bf16 %v163_v15, %v161_v14 }
  0x9a   :  { %151 = vmatmul.msk.bf16.vlgmr.msra.gmra.mxu1 %vm101_vm1, %v64_v16 }
 0x117   :  { %v114_v18 = vpop.f32.mrf.mxu1 }
 0x118   :  { %v115_v19 = vadd.f32 %v159_v17, %v114_v18 }
 0x11a   :  { %120 = vst.msk [vmem:[%s235_s5] sm:$0xff] %vm119_vm2, %v115_v19 }
 0x11f   :  { %v116_v20 = vpop.f32.mrf.mxu1 }
 0x120   :  { %v117_v21 = vadd.f32 %v159_v17, %v116_v20 }
 0x122   :  { %121 = vst.msk [vmem:[%s235_s5 + $0x8] sm:$0xff] %vm119_vm2, %v117_v21 }

</bundles_post_ra>
